<compile_context>
chip_gen: v5e
topology: v5e:2x2
jax: 0.10.0
libtpu: 0.0.40
codegen_flags: <defaults>
</compile_context>

<pallas_src>
import math

import jax
import jax.numpy as jnp
from jax.experimental import pallas as pl
from jax.experimental.pallas import tpu as pltpu


# ---------------------------------------------------------------------------
# Constructor-time precompute (matches SpatialPositionEncodingSine.init()).
# One-time setup work in the PyTorch module, so it stays in plain JAX.
# ---------------------------------------------------------------------------
def init_position_encoding(d_model, score_size):
    """Returns the position encoding of shape (1, 1, d_model, S, S), float32."""
    eps = 1e-6
    norm_scale = 2.0 * math.pi
    temperature = 10000.0
    num_pos_feats = d_model // 2

    ones = jnp.ones((1, score_size, score_size), jnp.float32)
    y_embed = jnp.cumsum(ones, axis=1)
    x_embed = jnp.cumsum(ones, axis=2)
    y_embed = y_embed / (y_embed[:, -1:, :] + eps) * norm_scale
    x_embed = x_embed / (x_embed[:, :, -1:] + eps) * norm_scale

    dim_t = jnp.arange(num_pos_feats, dtype=jnp.float32)
    dim_t = temperature ** (2.0 * jnp.floor(dim_t / 2.0) / num_pos_feats)

    pos_x = x_embed[:, :, :, None] / dim_t    # (1, S, S, num_pos_feats)
    pos_y = y_embed[:, :, :, None] / dim_t

    def interleave_sin_cos(p):
        s = jnp.sin(p[:, :, :, 0::2])
        c = jnp.cos(p[:, :, :, 1::2])
        # torch.stack((sin, cos), dim=4).flatten(3)
        return jnp.stack((s, c), axis=4).reshape(
            1, score_size, score_size, num_pos_feats)

    pos_x = interleave_sin_cos(pos_x)
    pos_y = interleave_sin_cos(pos_y)
    pos = jnp.concatenate((pos_y, pos_x), axis=3)   # (1, S, S, d_model)
    pos = jnp.transpose(pos, (0, 3, 1, 2))          # (1, d_model, S, S)
    return pos[:, None]                             # (1, 1, d_model, S, S)


# ---------------------------------------------------------------------------
# Pallas kernel: forward() = x + pos  (broadcast over batch dims).
# ---------------------------------------------------------------------------
def _make_add_kernel(cast_x):
    if cast_x:
        def kernel(x_ref, pos_ref, out_ref):
            # x_ref/out_ref: (TB, C, H*W) tile; pos_ref: (C, H*W), already in
            # out dtype (cast hoisted to the wrapper).
            out_ref[...] = x_ref[...].astype(out_ref.dtype) + pos_ref[...]
    else:
        def kernel(x_ref, pos_ref, out_ref):
            out_ref[...] = x_ref[...] + pos_ref[...]
    return kernel


def _vmem_limit_bytes():
    """Half of physical VMEM (capped), robust across v5e/v6e/v7x."""
    try:
        cap = int(pltpu.get_tpu_info().vmem_capacity_bytes)
    except Exception:
        cap = 64 << 20   # conservative fallback (v7x per-TC physical VMEM)
    return min(cap // 2, 64 << 20)   # 32 MiB on v7x, 64 MiB on v5e/v6e


def spatial_position_encoding_sine(x, pos, out_dtype=None):
    """Forward of SpatialPositionEncodingSine.

    x  : (B, C, H, W)   or (B, N, C, H, W)
    pos: (1, 1, C, H, W) from init_position_encoding.
    out_dtype: optionally force the output dtype (e.g. jnp.bfloat16 for a
        bandwidth-bound model running in bf16). Default matches the torch
        broadcast result dtype.

    Returns (1, B, C, H, W) or (1, B, N, C, H, W) — same as PyTorch
    broadcasting against the higher-rank pos.
    """
    if x.ndim == 4:
        lead = x.shape[:1]
    elif x.ndim == 5:
        lead = x.shape[:2]
    else:
        raise ValueError("The shape [{}] of input is invalid".format(x.shape))

    C, H, W = x.shape[-3:]
    assert pos.shape == (1, 1, C, H, W), pos.shape

    n = 1
    for d in lead:
        n *= d
    hw = H * W

    if out_dtype is None:
        out_dtype = jnp.result_type(x.dtype, pos.dtype)
    out_dtype = jnp.dtype(out_dtype)

    # Flatten: batch dims -> one grid axis; spatial dims -> lane-dense last
    # axis (multiple of 128 lanes for the demo S=16).  Cast of the
    # grid-invariant pos is hoisted out of the kernel.
    x_flat = x.reshape(n, C, hw)
    pos_flat = pos.reshape(C, hw).astype(out_dtype)

    x_bytes = jnp.dtype(x_flat.dtype).itemsize
    o_bytes = out_dtype.itemsize
    p_bytes = jnp.dtype(pos_flat.dtype).itemsize

    # --- Block size along the batch axis, sized from VMEM ------------------
    vmem_limit = _vmem_limit_bytes()
    per_batch_stream = C * hw * 2 * (x_bytes + o_bytes)   # double-buffered in+out
    pos_resident = 2 * C * hw * p_bytes                   # (conservatively 2x)
    budget = vmem_limit - pos_resident - (4 << 20)        # compiler headroom
    tb = budget // per_batch_stream
    tb = int(max(1, min(tb, n)))

    num_steps = int(pl.cdiv(n, tb))
    # For large problems prefer >=2 grid steps so both v7x TensorCores stream
    # concurrently; for tiny inputs one step minimizes pipeline overhead.
    total_stream_bytes = n * C * hw * (x_bytes + o_bytes)
    if num_steps == 1 and n >= 2 and total_stream_bytes > (4 << 20):
        tb = int(pl.cdiv(n, 2))
        num_steps = int(pl.cdiv(n, tb))

    kernel = _make_add_kernel(cast_x=(jnp.dtype(x_flat.dtype) != out_dtype))
    # Donate x's buffer as the output when dtypes match (no second HBM buffer
    # under jit/donation; XLA copies defensively otherwise, still correct).
    aliases = {0: 0} if jnp.dtype(x_flat.dtype) == out_dtype else {}

    out = pl.pallas_call(
        kernel,
        out_shape=jax.ShapeDtypeStruct((n, C, hw), out_dtype),
        grid=(num_steps,),
        in_specs=[
            pl.BlockSpec((tb, C, hw), lambda b: (b, 0, 0)),   # batch-tiled x
            pl.BlockSpec((C, hw), lambda b: (0, 0)),          # grid-invariant pos
        ],
        out_specs=pl.BlockSpec((tb, C, hw), lambda b: (b, 0, 0)),
        input_output_aliases=aliases,
        compiler_params=pltpu.CompilerParams(
            dimension_semantics=("parallel",),
            vmem_limit_bytes=int(vmem_limit),
        ),
    )(x_flat, pos_flat)

    out = out.reshape(*lead, C, H, W)
    # Extra leading 1 from broadcasting against the higher-rank pos (both the
    # 4-D and the 5-D torch branches produce it — see header comment).
    return out[None]


# ---------------------------------------------------------------------------
# Pure-JAX reference (exact broadcast semantics of the torch forward).
# ---------------------------------------------------------------------------
def _reference(x, pos):
    if x.ndim == 4:
        return x + pos                # pos: (1,1,C,S,S)        -> (1,B,C,S,S)
    elif x.ndim == 5:
        return x + pos[:, None]       # pos.unsqueeze(1): rank 6 -> (1,B,N,C,S,S)
    raise ValueError("The shape [{}] of input is invalid".format(x.shape))


if __name__ == "__main__":
    d_model, score_size = 32, 16
    B, N = 2, 3

    pos = init_position_encoding(d_model, score_size)

    key = jax.random.PRNGKey(0)
    k4, k5 = jax.random.split(key, 2)

    # 4-D path: x of shape (B, C, H, W)
    x4 = jax.random.normal(k4, (B, d_model, score_size, score_size), jnp.float32)
    ref4 = _reference(x4, pos)                       # computed before the kernel
    out4 = jax.block_until_ready(spatial_position_encoding_sine(x4, pos))
    assert out4.shape == ref4.shape == (1, B, d_model, score_size, score_size), out4.shape
    assert jnp.allclose(out4, ref4, atol=1e-6), float(jnp.max(jnp.abs(out4 - ref4)))

    # 5-D path: x of shape (B, N, C, H, W)
    x5 = jax.random.normal(k5, (B, N, d_model, score_size, score_size), jnp.float32)
    ref5 = _reference(x5, pos)
    out5 = jax.block_until_ready(spatial_position_encoding_sine(x5, pos))
    assert out5.shape == ref5.shape == (1, B, N, d_model, score_size, score_size), out5.shape
    assert jnp.allclose(out5, ref5, atol=1e-6), float(jnp.max(jnp.abs(out5 - ref5)))

    print("KERNEL_OK")
</pallas_src>

<mosaic_0001>
module attributes {stable_mosaic.version = 11 : i64} {
  func.func @kernel(%arg0: i32, %arg1: memref<2x32x256xf32, #tpu.memory_space<vmem>>, %arg2: memref<32x256xf32, #tpu.memory_space<vmem>>, %arg3: memref<2x32x256xf32, #tpu.memory_space<vmem>>) attributes {dimension_semantics = [#tpu.dimension_semantics<parallel>], iteration_bounds = array<i64: 1>, scalar_prefetch = 0 : i64, scratch_operands = 0 : i64, tpu.core_type = #tpu.core_type<tc>, window_params = [{transform_indices = @transform_0, window_bounds = array<i64: 2, 32, 256>}, {pipeline_mode = #tpu.pipeline_mode<synchronous>, transform_indices = @transform_1, window_bounds = array<i64: 32, 256>}, {transform_indices = @transform_2, window_bounds = array<i64: 2, 32, 256>}]} {
    %c0 = arith.constant 0 : index
    %c0_0 = arith.constant 0 : index
    %c0_1 = arith.constant 0 : index
    %0 = vector.load %arg1[%c0, %c0_0, %c0_1] : memref<2x32x256xf32, #tpu.memory_space<vmem>>, vector<2x32x256xf32>
    %c0_2 = arith.constant 0 : index
    %c0_3 = arith.constant 0 : index
    %1 = vector.load %arg2[%c0_2, %c0_3] : memref<32x256xf32, #tpu.memory_space<vmem>>, vector<32x256xf32>
    %2 = vector.shape_cast %1 : vector<32x256xf32> to vector<1x32x256xf32>
    %3 = vector.broadcast %2 : vector<1x32x256xf32> to vector<2x32x256xf32>
    %4 = arith.addf %0, %3 : vector<2x32x256xf32>
    %c0_4 = arith.constant 0 : index
    %c0_5 = arith.constant 0 : index
    %c0_6 = arith.constant 0 : index
    %5 = vector.load %arg3[%c0_4, %c0_5, %c0_6] : memref<2x32x256xf32, #tpu.memory_space<vmem>>, vector<2x32x256xf32>
    tpu.vector_store %arg3[%c0_4, %c0_5, %c0_6], %4 {strides = array<i32>} : memref<2x32x256xf32, #tpu.memory_space<vmem>>, vector<2x32x256xf32>,
    return
  }
  func.func @transform_0(%arg0: i32) -> (i32, i32, i32) {
    %c0_i32 = arith.constant 0 : i32
    %c0_i32_0 = arith.constant 0 : i32
    %c0_i32_1 = arith.constant 0 : i32
    return %arg0, %c0_i32, %c0_i32_0 : i32, i32, i32
  }
  func.func @transform_1(%arg0: i32) -> (i32, i32) {
    %c0_i32 = arith.constant 0 : i32
    %c0_i32_0 = arith.constant 0 : i32
    %c0_i32_1 = arith.constant 0 : i32
    return %c0_i32, %c0_i32_0 : i32, i32
  }
  func.func @transform_2(%arg0: i32) -> (i32, i32, i32) {
    %c0_i32 = arith.constant 0 : i32
    %c0_i32_0 = arith.constant 0 : i32
    %c0_i32_1 = arith.constant 0 : i32
    return %arg0, %c0_i32, %c0_i32_0 : i32, i32, i32
  }
}

</mosaic_0001>

<bundles_post_ra>
// kernel: tpu_custom_call.1
= control target key start
LH: loop header
LB: loop body
LE: loop exit
PB: predicated region body
PF: predicated region fallthrough
CT: control target
= control target key end

     0   :  { %7 = vsyncpa [#allocation3], 0  ;;  %s214_s0 = inlined_call_operand.hbm [shape: f32[2,32,256], index: 0, kind: input, shape index: {}, may-alias: {0,2}]   ;;  %s215_s1 = inlined_call_operand.vmem [shape: f32[32,256], index: 1, kind: input, shape index: {}]   ;;  %s216_s2 = inlined_call_operand.hbm [shape: f32[2,32,256], index: 2, kind: output, shape index: {}, may-alias: {0,2}]  }
   0x1   :  { %8 = vsyncpa [#allocation4], 0  ;;  %s13_s11 = sshll.u32 %s214_s0, 4  ;;  %s159_s12 = smov [#allocation2]   ;;  %s14_s11 = int_to_ptr.hbm [resolvable:$true] %s13_s11 }
   0x2   :  { %s15_s13 = sshll.u32 %s159_s12, 4  ;;  %s160_s14 = smov 256   ;;  %s16_s13 = int_to_ptr.vmem [resolvable:$true] %s15_s13 }
   0x3   :  { %s161_s15 = smov 16  }
   0x4   :  { %21 = dma.hbm_to_vmem [thread:$0]  %s14_s11, 2048, %s16_s13, [#allocation3], %s160_s14, %s160_s14, %s161_s15  }
   0x5   :  { %155 = dma.done.wait [#allocation3], 2048  }
   0x6   :  { %156 = vsyncadd [#allocation3], 4294965248  ;;  %v28_v0 = vld [vmem:[#allocation2] sm:$0xff]  ;;  %v29_v2 = vld [vmem:[#allocation2 + $0x8] sm:$0xff]  ;;  %s90_s6 = sshll.u32 %s216_s2, 4  ;;  %s91_s6 = int_to_ptr.hbm [resolvable:$true] %s90_s6 }
   0x7   :  { %v44_v1 = vld [vmem:[%s215_s1] sm:$0xff]  ;;  %v45_v4 = vld [vmem:[%s215_s1 + $0x8] sm:$0xff]  ;;  %v30_v5 = vld [vmem:[#allocation2 + $0x10] sm:$0xff] }
   0x8   :  { %v52_v3 = vadd.f32 %v44_v1, %v28_v0  ;;  %v46_v6 = vld [vmem:[%s215_s1 + $0x10] sm:$0xff]  ;;  %v53_v7 = vadd.f32 %v45_v4, %v29_v2  ;;  %v31_v9 = vld [vmem:[#allocation2 + $0x18] sm:$0xff]  ;;  %v32_v11 = vld [vmem:[#allocation2 + $0x20] sm:$0xff] }
   0x9   :  { %v54_v8 = vadd.f32 %v46_v6, %v30_v5  ;;  %v47_v10 = vld [vmem:[%s215_s1 + $0x18] sm:$0xff]  ;;  %v48_v13 = vld [vmem:[%s215_s1 + $0x20] sm:$0xff]  ;;  %v33_v14 = vld [vmem:[#allocation2 + $0x28] sm:$0xff] }
   0xa   :  { %68 = vst [vmem:[#allocation5] sm:$0xff] %v52_v3  ;;  %v55_v12 = vadd.f32 %v47_v10, %v31_v9  ;;  %v49_v15 = vld [vmem:[%s215_s1 + $0x28] sm:$0xff]  ;;  %v56_v16 = vadd.f32 %v48_v13, %v32_v11  ;;  %v34_v18 = vld [vmem:[#allocation2 + $0x30] sm:$0xff]  ;;  %v35_v20 = vld [vmem:[#allocation2 + $0x38] sm:$0xff] }
   0xb   :  { %69 = vst [vmem:[#allocation5 + $0x8] sm:$0xff] %v53_v7  ;;  %v57_v17 = vadd.f32 %v49_v15, %v33_v14  ;;  %v50_v19 = vld [vmem:[%s215_s1 + $0x30] sm:$0xff]  ;;  %v51_v22 = vld [vmem:[%s215_s1 + $0x38] sm:$0xff]  ;;  %v36_v23 = vld [vmem:[#allocation2 + $0x40] sm:$0xff]  ;;  %s162_s1 = smov [#allocation5]  }
   0xc   :  { %70 = vst [vmem:[#allocation5 + $0x10] sm:$0xff] %v54_v8  ;;  %v58_v21 = vadd.f32 %v50_v19, %v34_v18  ;;  %v37_v24 = vld [vmem:[#allocation2 + $0x48] sm:$0xff]  ;;  %v59_v25 = vadd.f32 %v51_v22, %v35_v20  ;;  %v38_v26 = vld [vmem:[#allocation2 + $0x50] sm:$0xff]  ;;  %v60_v27 = vadd.f32 %v44_v1, %v36_v23  ;;  %v39_v28 = vld [vmem:[#allocation2 + $0x58] sm:$0xff]  ;;  %s88_s3 = sshll.u32 %s162_s1, 4  ;;  %s89_s3 = int_to_ptr.vmem [resolvable:$true] %s88_s3 }
   0xd   :  { %71 = vst [vmem:[#allocation5 + $0x18] sm:$0xff] %v55_v12  ;;  %v61_v29 = vadd.f32 %v45_v4, %v37_v24  ;;  %v40_v30 = vld [vmem:[#allocation2 + $0x60] sm:$0xff]  ;;  %v62_v31 = vadd.f32 %v46_v6, %v38_v26  ;;  %v41_v32 = vld [vmem:[#allocation2 + $0x68] sm:$0xff]  ;;  %v63_v33 = vadd.f32 %v47_v10, %v39_v28  ;;  %v42_v34 = vld [vmem:[#allocation2 + $0x70] sm:$0xff] }
   0xe   :  { %72 = vst [vmem:[#allocation5 + $0x20] sm:$0xff] %v56_v16  ;;  %v64_v35 = vadd.f32 %v48_v13, %v40_v30  ;;  %v43_v36 = vld [vmem:[#allocation2 + $0x78] sm:$0xff]  ;;  %v65_v37 = vadd.f32 %v49_v15, %v41_v32  ;;  %v66_v38 = vadd.f32 %v50_v19, %v42_v34 }
   0xf   :  { %73 = vst [vmem:[#allocation5 + $0x28] sm:$0xff] %v57_v17  ;;  %v67_v39 = vadd.f32 %v51_v22, %v43_v36 }
  0x10   :  { %74 = vst [vmem:[#allocation5 + $0x30] sm:$0xff] %v58_v21 }
  0x11   :  { %75 = vst [vmem:[#allocation5 + $0x38] sm:$0xff] %v59_v25 }
  0x12   :  { %76 = vst [vmem:[#allocation5 + $0x40] sm:$0xff] %v60_v27 }
  0x13   :  { %77 = vst [vmem:[#allocation5 + $0x48] sm:$0xff] %v61_v29 }
  0x14   :  { %78 = vst [vmem:[#allocation5 + $0x50] sm:$0xff] %v62_v31 }
  0x15   :  { %79 = vst [vmem:[#allocation5 + $0x58] sm:$0xff] %v63_v33 }
  0x16   :  { %80 = vst [vmem:[#allocation5 + $0x60] sm:$0xff] %v64_v35 }
  0x17   :  { %81 = vst [vmem:[#allocation5 + $0x68] sm:$0xff] %v65_v37 }
  0x18   :  { %82 = vst [vmem:[#allocation5 + $0x70] sm:$0xff] %v66_v38 }
  0x19   :  { %83 = vst [vmem:[#allocation5 + $0x78] sm:$0xff] %v67_v39 }
  0x1a   :  { %96 = dma.vmem_to_hbm [thread:$0]  %s89_s3, 2048, %s91_s6, [#allocation4], %s160_s14, %s160_s14, %s161_s15  }
  0x1b   :  { %157 = dma.done.wait [#allocation4], 2048  }
  0x1c   :  { %158 = vsyncadd [#allocation4], 4294965248 }
  0x1d   :  { %101 = vsyncpa [#allocation3], 1 }
  0x1e   :  { %102 = vsyncpa [#allocation4], 1 }

</bundles_post_ra>
